<compile_context>
chip_gen: v6e
topology: v6e:2x2x1
jax: 0.10.0
libtpu: 0.0.40
codegen_flags: <defaults>
</compile_context>

<pallas_src>
from functools import partial

import jax
import jax.numpy as jnp
from jax.experimental import pallas as pl
from jax.experimental.pallas import tpu as pltpu

IN_DIM = 28 * 28   # 784 (multiple of 16 -> legal bf16 sublane tiling for w1)
HID = 300
OUT_DIM = 10

HID_PAD = 384      # next multiple of 128 >= 300 (sweep 512 on v6e/v7x if MXU-bound)
OUT_PAD = 128      # lane-dense output / N=128 for the third matmul


def _round_up(n, m):
    return (n + m - 1) // m * m


def _choose_tile_b(B, tile_b_max):
    """Batch tile: multiple of 8, <= tile_b_max, and >= 2 grid steps when possible."""
    b8 = _round_up(B, 8)
    if b8 >= 16:
        n_steps = max(2, pl.cdiv(b8, tile_b_max))   # keep 2 TCs busy on v7x
    else:
        n_steps = 1
    tile_b = _round_up(pl.cdiv(b8, n_steps), 8)
    b_pad = _round_up(b8, tile_b)
    return tile_b, b_pad


def fashion_net_kernel(x_ref, w1_ref, b1_ref, w2_ref, b2_ref, w3_ref, b3_ref,
                       o_ref):
    # ---- hidden1 + ReLU (bf16 matmul, f32 accumulate; x cast in-kernel) ----
    x = x_ref[...].astype(jnp.bfloat16)                       # (tile_b, 784)
    h1 = jnp.dot(x, w1_ref[...], preferred_element_type=jnp.float32)
    h1 = jnp.maximum(h1 + b1_ref[...], 0.0)
    # ---- hidden2 + ReLU ----
    h2 = jnp.dot(h1.astype(jnp.bfloat16), w2_ref[...],
                 preferred_element_type=jnp.float32)
    h2 = jnp.maximum(h2 + b2_ref[...], 0.0)
    # ---- hidden3 (logits, padded to 128 lanes) ----
    logits = jnp.dot(h2.astype(jnp.bfloat16), w3_ref[...],
                     preferred_element_type=jnp.float32)
    logits = logits + b3_ref[...]
    # Mask the 118 padded class lanes so they don't pollute the softmax.
    lane = jax.lax.broadcasted_iota(jnp.int32, logits.shape, 1)
    logits = jnp.where(lane < OUT_DIM, logits, -1e30)
    # ---- Softmax along dim=1 (exact normalization) ----
    m = jnp.max(logits, axis=1, keepdims=True)
    e = jnp.exp(logits - m)
    denom = jnp.sum(e, axis=1, keepdims=True)
    o_ref[...] = e / denom


def prepare_params(w1, b1, w2, b2, w3, b3):
    """One-time pad + bf16 cast of the weights (do this once, outside the serving loop).

    Weights are stored as (in, out) = PyTorch Linear.weight.T; biases as (1, out).
    Padded rows/cols/entries are exactly zero (and padded logit lanes are masked
    in-kernel), so the math matches the unpadded network up to bf16 rounding.
    """
    f32, bf16 = jnp.float32, jnp.bfloat16
    w1_p = jnp.zeros((IN_DIM, HID_PAD), bf16).at[:, :HID].set(w1.astype(bf16))
    b1_p = jnp.zeros((1, HID_PAD), f32).at[:, :HID].set(b1)
    w2_p = jnp.zeros((HID_PAD, HID_PAD), bf16).at[:HID, :HID].set(w2.astype(bf16))
    b2_p = jnp.zeros((1, HID_PAD), f32).at[:, :HID].set(b2)
    w3_p = jnp.zeros((HID_PAD, OUT_PAD), bf16).at[:HID, :OUT_DIM].set(w3.astype(bf16))
    b3_p = jnp.zeros((1, OUT_PAD), f32).at[:, :OUT_DIM].set(b3)
    return w1_p, b1_p, w2_p, b2_p, w3_p, b3_p


@partial(jax.jit, static_argnames=("tile_b_max",))
def fashion_net_forward(x, w1_p, b1_p, w2_p, b2_p, w3_p, b3_p, *, tile_b_max=512):
    """x: (B, 784) f32; padded params from prepare_params()."""
    B = x.shape[0]
    tile_b, b_pad = _choose_tile_b(B, tile_b_max)
    x_p = x if b_pad == B else jnp.pad(x, ((0, b_pad - B), (0, 0)))

    const = lambda shape: pl.BlockSpec(shape, lambda i: (0, 0))

    out = pl.pallas_call(
        fashion_net_kernel,
        out_shape=jax.ShapeDtypeStruct((b_pad, OUT_PAD), jnp.float32),
        grid=(b_pad // tile_b,),
        in_specs=[
            pl.BlockSpec((tile_b, IN_DIM), lambda i: (i, 0)),   # x tile (f32, unpadded features)
            const((IN_DIM, HID_PAD)), const((1, HID_PAD)),      # w1, b1 (VMEM-resident)
            const((HID_PAD, HID_PAD)), const((1, HID_PAD)),     # w2, b2 (VMEM-resident)
            const((HID_PAD, OUT_PAD)), const((1, OUT_PAD)),     # w3, b3 (VMEM-resident)
        ],
        out_specs=pl.BlockSpec((tile_b, OUT_PAD), lambda i: (i, 0)),
        compiler_params=pltpu.CompilerParams(
            dimension_semantics=("parallel",)),
    )(x_p, w1_p, b1_p, w2_p, b2_p, w3_p, b3_p)
    return out[:B, :OUT_DIM]


def init_params(key):
    """Deterministic param init mimicking nn.Linear's uniform(-1/sqrt(in), 1/sqrt(in))."""
    ks = jax.random.split(key, 6)

    def linear(kw, kb, fan_in, fan_out):
        bound = 1.0 / jnp.sqrt(jnp.float32(fan_in))
        w = jax.random.uniform(kw, (fan_in, fan_out), jnp.float32, -bound, bound)
        b = jax.random.uniform(kb, (1, fan_out), jnp.float32, -bound, bound)
        return w, b

    w1, b1 = linear(ks[0], ks[1], IN_DIM, HID)
    w2, b2 = linear(ks[2], ks[3], HID, HID)
    w3, b3 = linear(ks[4], ks[5], HID, OUT_DIM)
    return w1, b1, w2, b2, w3, b3


def reference_forward(x, w1, b1, w2, b2, w3, b3):
    h1 = jnp.maximum(x @ w1 + b1, 0.0)
    h2 = jnp.maximum(h1 @ w2 + b2, 0.0)
    logits = h2 @ w3 + b3
    return jax.nn.softmax(logits, axis=1)


if __name__ == "__main__":
    key = jax.random.PRNGKey(0)
    k_x, k_p = jax.random.split(key)

    B = 8  # small batch
    x = jax.random.normal(k_x, (B, IN_DIM), jnp.float32)
    params = init_params(k_p)

    padded = prepare_params(*params)           # one-time weight prep (hoisted)
    out = fashion_net_forward(x, *padded)
    out = jax.block_until_ready(out)

    ref = reference_forward(x, *params)        # f32 reference
    assert out.shape == (B, OUT_DIM)
    # bf16 matmuls (f32 accumulation) -> loosened tolerance vs f32 reference
    assert jnp.allclose(out, ref, atol=2e-2, rtol=2e-2), "mismatch vs reference"
    # exact softmax normalization -> rows sum to 1 within f32 rounding
    assert jnp.allclose(jnp.sum(out, axis=1), jnp.ones((B,)), atol=1e-5)

    print("KERNEL_OK")
</pallas_src>

<mosaic_0001>
module attributes {stable_mosaic.version = 11 : i64} {
  func.func @fashion_net_kernel(%arg0: i32, %arg1: memref<8x784xf32, #tpu.memory_space<vmem>>, %arg2: memref<784x384xbf16, #tpu.memory_space<vmem>>, %arg3: memref<1x384xf32, #tpu.memory_space<vmem>>, %arg4: memref<384x384xbf16, #tpu.memory_space<vmem>>, %arg5: memref<1x384xf32, #tpu.memory_space<vmem>>, %arg6: memref<384x128xbf16, #tpu.memory_space<vmem>>, %arg7: memref<1x128xf32, #tpu.memory_space<vmem>>, %arg8: memref<8x128xf32, #tpu.memory_space<vmem>>) attributes {dimension_semantics = [#tpu.dimension_semantics<parallel>], iteration_bounds = array<i64: 1>, scalar_prefetch = 0 : i64, scratch_operands = 0 : i64, tpu.core_type = #tpu.core_type<tc>, window_params = [{transform_indices = @transform_0, window_bounds = array<i64: 8, 784>}, {pipeline_mode = #tpu.pipeline_mode<synchronous>, transform_indices = @transform_1, window_bounds = array<i64: 784, 384>}, {pipeline_mode = #tpu.pipeline_mode<synchronous>, transform_indices = @transform_2, window_bounds = array<i64: 1, 384>}, {pipeline_mode = #tpu.pipeline_mode<synchronous>, transform_indices = @transform_3, window_bounds = array<i64: 384, 384>}, {pipeline_mode = #tpu.pipeline_mode<synchronous>, transform_indices = @transform_4, window_bounds = array<i64: 1, 384>}, {pipeline_mode = #tpu.pipeline_mode<synchronous>, transform_indices = @transform_5, window_bounds = array<i64: 384, 128>}, {pipeline_mode = #tpu.pipeline_mode<synchronous>, transform_indices = @transform_6, window_bounds = array<i64: 1, 128>}, {transform_indices = @transform_7, window_bounds = array<i64: 8, 128>}]} {
    %c0 = arith.constant 0 : index
    %c0_0 = arith.constant 0 : index
    %0 = vector.load %arg1[%c0, %c0_0] : memref<8x784xf32, #tpu.memory_space<vmem>>, vector<8x784xf32>
    %1 = arith.truncf %0 : vector<8x784xf32> to vector<8x784xbf16>
    %c0_1 = arith.constant 0 : index
    %c0_2 = arith.constant 0 : index
    %2 = vector.load %arg2[%c0_1, %c0_2] : memref<784x384xbf16, #tpu.memory_space<vmem>>, vector<784x384xbf16>
    %cst = arith.constant dense<0.000000e+00> : vector<8x384xf32>
    %3 = tpu.matmul %1, %2, %cst {dimension_numbers = #tpu.dot_dimension_numbers<[1], [0], [0], [1], [0, 0, 1, 1], [], []>} : vector<8x784xbf16>, vector<784x384xbf16>, vector<8x384xf32> -> vector<8x384xf32>
    %c0_3 = arith.constant 0 : index
    %c0_4 = arith.constant 0 : index
    %4 = vector.load %arg3[%c0_3, %c0_4] : memref<1x384xf32, #tpu.memory_space<vmem>>, vector<1x384xf32>
    %5 = vector.broadcast %4 : vector<1x384xf32> to vector<8x384xf32>
    %6 = arith.addf %3, %5 : vector<8x384xf32>
    %cst_5 = arith.constant 0.000000e+00 : f32
    %7 = vector.broadcast %cst_5 : f32 to vector<8x384xf32>
    %8 = arith.maximumf %6, %7 : vector<8x384xf32>
    %9 = arith.truncf %8 : vector<8x384xf32> to vector<8x384xbf16>
    %c0_6 = arith.constant 0 : index
    %c0_7 = arith.constant 0 : index
    %10 = vector.load %arg4[%c0_6, %c0_7] : memref<384x384xbf16, #tpu.memory_space<vmem>>, vector<384x384xbf16>
    %cst_8 = arith.constant dense<0.000000e+00> : vector<8x384xf32>
    %11 = tpu.matmul %9, %10, %cst_8 {dimension_numbers = #tpu.dot_dimension_numbers<[1], [0], [0], [1], [0, 0, 1, 1], [], []>} : vector<8x384xbf16>, vector<384x384xbf16>, vector<8x384xf32> -> vector<8x384xf32>
    %c0_9 = arith.constant 0 : index
    %c0_10 = arith.constant 0 : index
    %12 = vector.load %arg5[%c0_9, %c0_10] : memref<1x384xf32, #tpu.memory_space<vmem>>, vector<1x384xf32>
    %13 = vector.broadcast %12 : vector<1x384xf32> to vector<8x384xf32>
    %14 = arith.addf %11, %13 : vector<8x384xf32>
    %cst_11 = arith.constant 0.000000e+00 : f32
    %15 = vector.broadcast %cst_11 : f32 to vector<8x384xf32>
    %16 = arith.maximumf %14, %15 : vector<8x384xf32>
    %17 = arith.truncf %16 : vector<8x384xf32> to vector<8x384xbf16>
    %c0_12 = arith.constant 0 : index
    %c0_13 = arith.constant 0 : index
    %18 = vector.load %arg6[%c0_12, %c0_13] : memref<384x128xbf16, #tpu.memory_space<vmem>>, vector<384x128xbf16>
    %cst_14 = arith.constant dense<0.000000e+00> : vector<8x128xf32>
    %19 = tpu.matmul %17, %18, %cst_14 {dimension_numbers = #tpu.dot_dimension_numbers<[1], [0], [0], [1], [0, 0, 1, 1], [], []>} : vector<8x384xbf16>, vector<384x128xbf16>, vector<8x128xf32> -> vector<8x128xf32>
    %c0_15 = arith.constant 0 : index
    %c0_16 = arith.constant 0 : index
    %20 = vector.load %arg7[%c0_15, %c0_16] : memref<1x128xf32, #tpu.memory_space<vmem>>, vector<1x128xf32>
    %21 = vector.broadcast %20 : vector<1x128xf32> to vector<8x128xf32>
    %22 = arith.addf %19, %21 : vector<8x128xf32>
    %23 = tpu.iota {dimensions = array<i32: 1>} : vector<8x128xi32>
    %c10_i32 = arith.constant 10 : i32
    %24 = vector.broadcast %c10_i32 : i32 to vector<8x128xi32>
    %25 = arith.cmpi slt, %23, %24 : vector<8x128xi32>
    %cst_17 = arith.constant -1.000000e+30 : f32
    %26 = vector.broadcast %cst_17 : f32 to vector<8x128xf32>
    %27 = arith.select %25, %22, %26 : vector<8x128xi1>, vector<8x128xf32>
    %cst_18 = arith.constant dense<0xFF800000> : vector<8xf32>
    %28 = vector.multi_reduction <maximumf>, %27, %cst_18 [1] : vector<8x128xf32> to vector<8xf32>
    %29 = vector.shape_cast %28 : vector<8xf32> to vector<8x1xf32>
    %30 = vector.broadcast %29 : vector<8x1xf32> to vector<8x128xf32>
    %31 = arith.subf %27, %30 : vector<8x128xf32>
    %32 = math.exp %31 : vector<8x128xf32>
    %cst_19 = arith.constant dense<0.000000e+00> : vector<8xf32>
    %33 = vector.multi_reduction <add>, %32, %cst_19 [1] : vector<8x128xf32> to vector<8xf32>
    %34 = vector.shape_cast %33 : vector<8xf32> to vector<8x1xf32>
    %35 = vector.broadcast %34 : vector<8x1xf32> to vector<8x128xf32>
    %36 = arith.divf %32, %35 : vector<8x128xf32>
    %c0_20 = arith.constant 0 : index
    %c0_21 = arith.constant 0 : index
    %37 = vector.load %arg8[%c0_20, %c0_21] : memref<8x128xf32, #tpu.memory_space<vmem>>, vector<8x128xf32>
    tpu.vector_store %arg8[%c0_20, %c0_21], %36 {strides = array<i32>} : memref<8x128xf32, #tpu.memory_space<vmem>>, vector<8x128xf32>,
    return
  }
  func.func @transform_0(%arg0: i32) -> (i32, i32) {
    %c0_i32 = arith.constant 0 : i32
    %c0_i32_0 = arith.constant 0 : i32
    return %arg0, %c0_i32 : i32, i32
  }
  func.func @transform_1(%arg0: i32) -> (i32, i32) {
    %c0_i32 = arith.constant 0 : i32
    %c0_i32_0 = arith.constant 0 : i32
    %c0_i32_1 = arith.constant 0 : i32
    return %c0_i32, %c0_i32_0 : i32, i32
  }
  func.func @transform_2(%arg0: i32) -> (i32, i32) {
    %c0_i32 = arith.constant 0 : i32
    %c0_i32_0 = arith.constant 0 : i32
    %c0_i32_1 = arith.constant 0 : i32
    return %c0_i32, %c0_i32_0 : i32, i32
  }
  func.func @transform_3(%arg0: i32) -> (i32, i32) {
    %c0_i32 = arith.constant 0 : i32
    %c0_i32_0 = arith.constant 0 : i32
    %c0_i32_1 = arith.constant 0 : i32
    return %c0_i32, %c0_i32_0 : i32, i32
  }
  func.func @transform_4(%arg0: i32) -> (i32, i32) {
    %c0_i32 = arith.constant 0 : i32
    %c0_i32_0 = arith.constant 0 : i32
    %c0_i32_1 = arith.constant 0 : i32
    return %c0_i32, %c0_i32_0 : i32, i32
  }
  func.func @transform_5(%arg0: i32) -> (i32, i32) {
    %c0_i32 = arith.constant 0 : i32
    %c0_i32_0 = arith.constant 0 : i32
    %c0_i32_1 = arith.constant 0 : i32
    return %c0_i32, %c0_i32_0 : i32, i32
  }
  func.func @transform_6(%arg0: i32) -> (i32, i32) {
    %c0_i32 = arith.constant 0 : i32
    %c0_i32_0 = arith.constant 0 : i32
    %c0_i32_1 = arith.constant 0 : i32
    return %c0_i32, %c0_i32_0 : i32, i32
  }
  func.func @transform_7(%arg0: i32) -> (i32, i32) {
    %c0_i32 = arith.constant 0 : i32
    %c0_i32_0 = arith.constant 0 : i32
    return %arg0, %c0_i32 : i32, i32
  }
}

</mosaic_0001>

<bundles_post_ra>
// kernel: fashion_net_forward.1
= control target key start
LH: loop header
LB: loop body
LE: loop exit
PB: predicated region body
PF: predicated region fallthrough
CT: control target
= control target key end

     0   :  { %12 = vsyncpa [#allocation3], 0  ;;  %s3407_s0 = inlined_call_operand.hbm [shape: f32[8,784], index: 0, kind: input, shape index: {}]   ;;  %s3408_s1 = inlined_call_operand.hbm [shape: bf16[784,384], index: 1, kind: input, shape index: {}]   ;;  %s3409_s2 = inlined_call_operand.vmem [shape: f32[1,384], index: 2, kind: input, shape index: {}]   ;;  %s3410_s3 = inlined_call_operand.hbm [shape: bf16[384,384], index: 3, kind: input, shape index: {}]   ;;  %s3411_s4 = inlined_call_operand.vmem [shape: f32[1,384], index: 4, kind: input, shape index: {}]   ;;  %s3412_s5 = inlined_call_operand.hbm [shape: bf16[384,128], index: 5, kind: input, shape index: {}]   ;;  %s3413_s6 = inlined_call_operand.vmem [shape: f32[1,128], index: 6, kind: input, shape index: {}]   ;;  %s3414_s7 = inlined_call_operand.hbm [shape: f32[8,128], index: 7, kind: output, shape index: {}]  }
   0x1   :  { %13 = vsyncpa [#allocation6], 0 }
   0x2   :  { %14 = vsyncpa [#allocation9], 0 }
   0x3   :  { %15 = vsyncpa [#allocation4], 0  ;;  %s3263_s24 = smov [#allocation5]  }
   0x4   :  { %s31_s25 = sshll.u32 %s3263_s24, 4  ;;  %s32_s25 = int_to_ptr.vmem [resolvable:$true] %s31_s25 }
   0x5   :  { %s3163_s26 = scalar_lea.vmem %s32_s25, 18816  ;;  %p3168_p1 = scmp.lt.s32.totalorder %s32_s25, %s32_s25 }
   0x6   :  { %p3164_p0 = scmp.ne.s32.totalorder %s32_s25, %s3163_s26  ;;  %p3169_p2 = scmp.lt.s32.totalorder %s3163_s26, %s3163_s26 }
   0x8   :  { %p3170_p3 = por %p3169_p2, %p3168_p1 }
   0xa   :  { %p3171_p4 = pnand %p3170_p3, %p3164_p0 }
   0xc   :  { %3174 = shalt.err (!%p3171_p4)
}
   0xd   :  { %s3264_s27 = smov 192   ;;  %s3265_s28 = smov 12  }
   0xe   :  { %37 = dma.hbm_to_vmem [thread:$0]  %s3408_s1, 18816, %s32_s25, [#allocation6], %s3264_s27, %s3264_s27, %s3265_s28  }
   0xf   :  { %s3266_s8 = smov [#allocation2]   ;;  %s3267_s10 = smov [#allocation7]  }
  0x10   :  { %s22_s9 = sshll.u32 %s3266_s8, 4  ;;  %s45_s11 = sshll.u32 %s3267_s10, 4  ;;  %s23_s9 = int_to_ptr.vmem [resolvable:$true] %s22_s9  ;;  %s46_s11 = int_to_ptr.vmem [resolvable:$true] %s45_s11 }
  0x11   :  { %s3183_s12 = scalar_lea.vmem %s23_s9, 896  ;;  %p3188_p6 = scmp.lt.s32.totalorder %s23_s9, %s23_s9 }
  0x12   :  { %p3184_p5 = scmp.ne.s32.totalorder %s23_s9, %s3183_s12  ;;  %p3189_p7 = scmp.lt.s32.totalorder %s3183_s12, %s3183_s12 }
  0x14   :  { %p3190_p8 = por %p3189_p7, %p3188_p6 }
  0x16   :  { %p3191_p9 = pnand %p3190_p8, %p3184_p5 }
  0x18   :  { %3194 = shalt.err (!%p3191_p9)
}
  0x19   :  { %25 = dma.hbm_to_vmem [thread:$0]  %s3407_s0, 896, %s23_s9, [#allocation3]  }
  0x1a   :  { %s3203_s15 = scalar_lea.vmem %s46_s11, 9216  ;;  %p3208_p11 = scmp.lt.s32.totalorder %s46_s11, %s46_s11 }
  0x1b   :  { %p3204_p10 = scmp.ne.s32.totalorder %s46_s11, %s3203_s15  ;;  %p3209_p12 = scmp.lt.s32.totalorder %s3203_s15, %s3203_s15 }
  0x1d   :  { %p3210_p13 = por %p3209_p12, %p3208_p11 }
  0x1f   :  { %p3211_p0 = pnand %p3210_p13, %p3204_p10 }
  0x21   :  { %3214 = shalt.err (!%p3211_p0)
}
  0x22   :  { %51 = dma.hbm_to_vmem [thread:$0]  %s3410_s3, 9216, %s46_s11, [#allocation6], %s3264_s27, %s3264_s27, %s3265_s28  }
  0x23   :  { %s3268_s17 = smov [#allocation8]  }
  0x24   :  { %s59_s18 = sshll.u32 %s3268_s17, 4  ;;  %s60_s18 = int_to_ptr.vmem [resolvable:$true] %s59_s18 }
  0x25   :  { %s3223_s19 = scalar_lea.vmem %s60_s18, 3072  ;;  %p3228_p2 = scmp.lt.s32.totalorder %s60_s18, %s60_s18 }
  0x26   :  { %p3224_p1 = scmp.ne.s32.totalorder %s60_s18, %s3223_s19  ;;  %p3229_p3 = scmp.lt.s32.totalorder %s3223_s19, %s3223_s19 }
  0x28   :  { %p3230_p4 = por %p3229_p3, %p3228_p2 }
  0x2a   :  { %p3231_p5 = pnand %p3230_p4, %p3224_p1 }
  0x2c   :  { %3234 = shalt.err (!%p3231_p5)
}
  0x2d   :  { %s3269_s0 = smov 64   ;;  %s3270_s20 = smov 4  }
  0x2e   :  { %65 = dma.hbm_to_vmem [thread:$0]  %s3412_s5, 3072, %s60_s18, [#allocation9], %s3269_s0, %s3269_s0, %s3270_s20  }
  0x2f   :  { %3255 = dma.done.wait [#allocation3], 896  }
  0x30   :  { %3256 = vsyncadd [#allocation3], 4294966400 }
  0x31   :  { %3257 = dma.done.wait [#allocation6], 28032  }
  0x32   :  { %3258 = vsyncadd [#allocation6], 4294939264 }
  0x33   :  { %3259 = dma.done.wait [#allocation9], 3072  }
  0x34   :  { %3260 = vsyncadd [#allocation9], 4294964224  ;;  %v2835_v0 = vld [vmem:[#allocation5 + $0xac] ss:$12 sps:$4 sm:$0xff]   ;;  %v2837_v1 = vld [vmem:[#allocation5 + $0xa8] ss:$12 sps:$4 sm:$0xff]  }
  0x35   :  { %1096 = vmatprep.subr.bf16.mxu0 %v2835_v0  ;;  %v2838_v2 = vld [vmem:[#allocation5 + $0x22c] ss:$12 sps:$4 sm:$0xff]   ;;  %v2840_v3 = vld [vmem:[#allocation5 + $0x228] ss:$12 sps:$4 sm:$0xff]   ;;  %v2843_v5 = vld [vmem:[#allocation5 + $0x90] ss:$12 sps:$4 sm:$0xff]  }
  0x36   :  { %1097 = vmatpush1.bf16.msra.mxu0 %v2837_v1  ;;  %v2841_v4 = vld [vmem:[#allocation5 + $0x94] ss:$12 sps:$4 sm:$0xff]   ;;  %1137 = vmatprep.subr.bf16.mxu1 %v2838_v2  ;;  %v2846_v7 = vld [vmem:[#allocation5 + $0x210] ss:$12 sps:$4 sm:$0xff]   ;;  %v2849_v9 = vld [vmem:[#allocation5 + $0x78] ss:$12 sps:$4 sm:$0xff]  }
  0x37   :  { %v2844_v6 = vld [vmem:[#allocation5 + $0x214] ss:$12 sps:$4 sm:$0xff]   ;;  %1138 = vmatpush1.bf16.msra.mxu1 %v2840_v3  ;;  %1098 = vmatprep.subr.bf16.mxu0 %v2841_v4  ;;  %v2847_v8 = vld [vmem:[#allocation5 + $0x7c] ss:$12 sps:$4 sm:$0xff]   ;;  %v2853_v11 = vld [vmem:[#allocation5 + $0x64] ss:$12 sps:$4 sm:$0xff]  }
  0x38   :  { %1139 = vmatprep.subr.bf16.mxu1 %v2844_v6  ;;  %v2850_v10 = vld [vmem:[#allocation5 + $0x1fc] ss:$12 sps:$4 sm:$0xff]   ;;  %v2852_v12 = vld [vmem:[#allocation5 + $0x1f8] ss:$12 sps:$4 sm:$0xff]   ;;  %v2855_v14 = vld [vmem:[#allocation5 + $0x60] ss:$12 sps:$4 sm:$0xff]  }
  0x39   :  { %v2856_v13 = vld [vmem:[#allocation5 + $0x1e4] ss:$12 sps:$4 sm:$0xff]   ;;  %v2859_v15 = vld [vmem:[#allocation5 + $0x4c] ss:$12 sps:$4 sm:$0xff]   ;;  %v2861_v18 = vld [vmem:[#allocation5 + $0x48] ss:$12 sps:$4 sm:$0xff]  }
  0x3a   :  { %1099 = vmatpush1.bf16.msra.mxu0 %v2843_v5  ;;  %v2858_v16 = vld [vmem:[#allocation5 + $0x1e0] ss:$12 sps:$4 sm:$0xff]   ;;  %v2864_v20 = vld [vmem:[#allocation5 + $0x1c8] ss:$12 sps:$4 sm:$0xff]   ;;  %v2867_v22 = vld [vmem:[#allocation5 + $0x30] ss:$12 sps:$4 sm:$0xff]  }
  0x3b   :  { %1100 = vmatprep.subr.bf16.mxu0 %v2847_v8  ;;  %1140 = vmatpush1.bf16.msra.mxu1 %v2846_v7  ;;  %v2862_v17 = vld [vmem:[#allocation5 + $0x1cc] ss:$12 sps:$4 sm:$0xff]   ;;  %v2865_v19 = vld [vmem:[#allocation5 + $0x34] ss:$12 sps:$4 sm:$0xff]   ;;  %v2871_v23 = vld [vmem:[#allocation5 + $0x1c] ss:$12 sps:$4 sm:$0xff]  }
  0x3c   :  { %1141 = vmatprep.subr.bf16.mxu1 %v2850_v10  ;;  %v2868_v21 = vld [vmem:[#allocation5 + $0x1b4] ss:$12 sps:$4 sm:$0xff]   ;;  %v2870_v24 = vld [vmem:[#allocation5 + $0x1b0] ss:$12 sps:$4 sm:$0xff]   ;;  %v2873_v26 = vld [vmem:[#allocation5 + $0x18] ss:$12 sps:$4 sm:$0xff]  }
  0x3d   :  { %v2874_v25 = vld [vmem:[#allocation5 + $0x19c] ss:$12 sps:$4 sm:$0xff]   ;;  %v2877_v27 = vld [vmem:[#allocation5 + $0x4] ss:$12 sps:$4 sm:$0xff]   ;;  %v2879_v30 = vld [vmem:[#allocation5] ss:$12 sps:$4 sm:$0xff]  }
  0x3e   :  { %1101 = vmatpush1.bf16.msra.mxu0 %v2849_v9  ;;  %v2876_v28 = vld [vmem:[#allocation5 + $0x198] ss:$12 sps:$4 sm:$0xff]   ;;  %v2882_v32 = vld [vmem:[#allocation5 + $0x180] ss:$12 sps:$4 sm:$0xff]   ;;  %v2885_v34 = vld [vmem:[#allocation5 + $0x168] ss:$12 sps:$4 sm:$0xff]  }
  0x3f   :  { %1102 = vmatprep.subr.bf16.mxu0 %v2853_v11  ;;  %1142 = vmatpush1.bf16.msra.mxu1 %v2852_v12  ;;  %v2880_v29 = vld [vmem:[#allocation5 + $0x184] ss:$12 sps:$4 sm:$0xff]   ;;  %v2883_v31 = vld [vmem:[#allocation5 + $0x16c] ss:$12 sps:$4 sm:$0xff]   ;;  %v2889_v35 = vld [vmem:[#allocation5 + $0x154] ss:$12 sps:$4 sm:$0xff]  }
  0x40   :  { %1143 = vmatprep.subr.bf16.mxu1 %v2856_v13  ;;  %v2886_v33 = vld [vmem:[#allocation5 + $0x2ec] ss:$12 sps:$4 sm:$0xff]   ;;  %v2888_v36 = vld [vmem:[#allocation5 + $0x2e8] ss:$12 sps:$4 sm:$0xff]   ;;  %v2891_v38 = vld [vmem:[#allocation5 + $0x150] ss:$12 sps:$4 sm:$0xff]  }
  0x41   :  { %v2892_v37 = vld [vmem:[#allocation5 + $0x2d4] ss:$12 sps:$4 sm:$0xff]   ;;  %v2895_v39 = vld [vmem:[#allocation5 + $0x13c] ss:$12 sps:$4 sm:$0xff]   ;;  %v2897_v42 = vld [vmem:[#allocation5 + $0x138] ss:$12 sps:$4 sm:$0xff]  }
  0x42   :  { %1103 = vmatpush1.bf16.msra.mxu0 %v2855_v14  ;;  %v2894_v40 = vld [vmem:[#allocation5 + $0x2d0] ss:$12 sps:$4 sm:$0xff]   ;;  %v2900_v44 = vld [vmem:[#allocation5 + $0x2b8] ss:$12 sps:$4 sm:$0xff]   ;;  %v2903_v47 = vld [vmem:[#allocation5 + $0x120] ss:$12 sps:$4 sm:$0xff]  }
  0x43   :  { %1104 = vmatprep.subr.bf16.mxu0 %v2859_v15  ;;  %1144 = vmatpush1.bf16.msra.mxu1 %v2858_v16  ;;  %v2898_v41 = vld [vmem:[#allocation5 + $0x2bc] ss:$12 sps:$4 sm:$0xff]   ;;  %v2901_v43 = vld [vmem:[#allocation5 + $0x124] ss:$12 sps:$4 sm:$0xff]   ;;  %v2907_v49 = vld [vmem:[#allocation5 + $0x10c] ss:$12 sps:$4 sm:$0xff]  }
  0x44   :  { %1145 = vmatprep.subr.bf16.mxu1 %v2862_v17  ;;  %v2904_v45 = vld [vmem:[#allocation5 + $0x2a4] ss:$12 sps:$4 sm:$0xff]   ;;  %v2906_v51 = vld [vmem:[#allocation5 + $0x2a0] ss:$12 sps:$4 sm:$0xff]   ;;  %v2909_v54 = vld [vmem:[#allocation5 + $0x108] ss:$12 sps:$4 sm:$0xff]  }
  0x45   :  { %v82_v46 = vld [vmem:[#allocation2 + $0x8] sm:$0xff]  ;;  %v84_v50 = vld [vmem:[#allocation2 + $0x18] sm:$0xff]  ;;  %v2910_v53 = vld [vmem:[#allocation5 + $0x28c] ss:$12 sps:$4 sm:$0xff]   ;;  %vm3273_vm0 = vmmov 0   ;;  %vm1092_vm1 = vcmask 130048  }
  0x46   :  { %1105 = vmatpush1.bf16.msra.mxu0 %v2861_v18  ;;  %v89_v48 = vpack.c.bf16 %v82_v46, %v82_v46  ;;  %v3327_v52 = vpack.c.bf16 %v84_v50, %v84_v50  ;;  %v2913_v55 = vld [vmem:[#allocation5 + $0xf4] ss:$12 sps:$4 sm:$0xff]   ;;  %v2915_v58 = vld [vmem:[#allocation5 + $0xf0] ss:$12 sps:$4 sm:$0xff]   ;;  %v2921_v62 = vld [vmem:[#allocation5 + $0xd8] ss:$12 sps:$4 sm:$0xff]  }
  0x47   :  { %1106 = vmatprep.subr.bf16.mxu0 %v2865_v19  ;;  %1146 = vmatpush1.bf16.msra.mxu1 %v2864_v20  ;;  %v2912_v56 = vld [vmem:[#allocation5 + $0x288] ss:$12 sps:$4 sm:$0xff]   ;;  %v2918_v60 = vld [vmem:[#allocation5 + $0x270] ss:$12 sps:$4 sm:$0xff]   ;;  %v2924_v63 = vld [vmem:[#allocation5 + $0x258] ss:$12 sps:$4 sm:$0xff]  }
  0x48   :  { %1147 = vmatprep.subr.bf16.mxu1 %v2868_v21  ;;  %1128 = vmatprep.mubr.bf16.mxu0 %v89_v48  ;;  %v2916_v57 = vld [vmem:[#allocation5 + $0x274] ss:$12 sps:$4 sm:$0xff]   ;;  %v2919_v59 = vld [vmem:[#allocation5 + $0xdc] ss:$12 sps:$4 sm:$0xff]   ;;  %v2925_v0 = vld [vmem:[#allocation5 + $0xc4] ss:$12 sps:$4 sm:$0xff]  }
  0x49   :  { %1169 = vmatprep.mubr.bf16.mxu1 %v3327_v52  ;;  %v2922_v61 = vld [vmem:[#allocation5 + $0x25c] ss:$12 sps:$4 sm:$0xff]   ;;  %v2927_v1 = vld [vmem:[#allocation5 + $0xc0] ss:$12 sps:$4 sm:$0xff]   ;;  %v2928_v2 = vld [vmem:[#allocation5 + $0x244] ss:$12 sps:$4 sm:$0xff]  }
  0x4a   :  { %1107 = vmatpush1.bf16.msra.mxu0 %v2867_v22  ;;  %v2930_v3 = vld [vmem:[#allocation5 + $0x240] ss:$12 sps:$4 sm:$0xff]   ;;  %v83_v6 = vld [vmem:[#allocation2 + $0x10] sm:$0xff]  ;;  %v2931_v9 = vld [vmem:[#allocation5 + $0x3a8] ss:$12 sps:$4 sm:$0xff]  }
  0x4b   :  { %1108 = vmatprep.subr.bf16.mxu0 %v2871_v23  ;;  %1148 = vmatpush1.bf16.msra.mxu1 %v2870_v24  ;;  %v81_v4 = vld [vmem:[#allocation2] sm:$0xff]  ;;  %v2937_v8 = vld [vmem:[#allocation5 + $0x170] ss:$12 sps:$4 sm:$0xff]   ;;  %v3332_v10 = vpack.c.bf16 %v83_v6, %v83_v6  ;;  %v2936_v11 = vld [vmem:[#allocation5 + $0x394] ss:$12 sps:$4 sm:$0xff]  }
  0x4c   :  { %1149 = vmatprep.subr.bf16.mxu1 %v2874_v25  ;;  %v2933_v5 = vld [vmem:[#allocation5 + $0x3ac] ss:$12 sps:$4 sm:$0xff]   ;;  %v3330_v7 = vpack.c.bf16 %v81_v4, %v81_v4  ;;  %v2938_v12 = vld [vmem:[#allocation5 + $0xb0] ss:$12 sps:$4 sm:$0xff]   ;;  %v2952_v21 = vld [vmem:[#allocation5 + $0x128] ss:$12 sps:$4 sm:$0xff]  }
  0x4d   :  { %v2942_v13 = vld [vmem:[#allocation5 + $0x158] ss:$12 sps:$4 sm:$0xff]   ;;  %v2934_v14 = vld [vmem:[#allocation5 + $0x390] ss:$12 sps:$4 sm:$0xff]   ;;  %v2947_v17 = vld [vmem:[#allocation5 + $0x140] ss:$12 sps:$4 sm:$0xff]  }
  0x4e   :  { %1109 = vmatpush1.bf16.msra.mxu0 %v2873_v26  ;;  %v2941_v15 = vld [vmem:[#allocation5 + $0x37c] ss:$12 sps:$4 sm:$0xff]   ;;  %v2943_v16 = vld [vmem:[#allocation5 + $0x98] ss:$12 sps:$4 sm:$0xff]   ;;  %v2948_v20 = vld [vmem:[#allocation5 + $0x80] ss:$12 sps:$4 sm:$0xff]  }
  0x4f   :  { %1110 = vmatprep.subr.bf16.mxu0 %v2877_v27  ;;  %1150 = vmatpush1.bf16.msra.mxu1 %v2876_v28  ;;  %v2939_v18 = vld [vmem:[#allocation5 + $0x378] ss:$12 sps:$4 sm:$0xff]   ;;  %v2944_v22 = vld [vmem:[#allocation5 + $0x360] ss:$12 sps:$4 sm:$0xff]   ;;  %v2953_v24 = vld [vmem:[#allocation5 + $0x68] ss:$12 sps:$4 sm:$0xff]  }
  0x50   :  { %1151 = vmatprep.subr.bf16.mxu1 %v2880_v29  ;;  %v2946_v19 = vld [vmem:[#allocation5 + $0x364] ss:$12 sps:$4 sm:$0xff]   ;;  %v2951_v23 = vld [vmem:[#allocation5 + $0x34c] ss:$12 sps:$4 sm:$0xff]   ;;  %v2949_v26 = vld [vmem:[#allocation5 + $0x348] ss:$12 sps:$4 sm:$0xff]  }
  0x51   :  { %v2957_v25 = vld [vmem:[#allocation5 + $0x110] ss:$12 sps:$4 sm:$0xff]   ;;  %v2956_v27 = vld [vmem:[#allocation5 + $0x334] ss:$12 sps:$4 sm:$0xff]   ;;  %v2962_v29 = vld [vmem:[#allocation5 + $0xf8] ss:$12 sps:$4 sm:$0xff]  }
  0x52   :  { %1111 = vmatpush1.bf16.msra.mxu0 %v2879_v30  ;;  %v2958_v28 = vld [vmem:[#allocation5 + $0x50] ss:$12 sps:$4 sm:$0xff]   ;;  %v2983_v50 = vld [vmem:[#allocation5 + $0x218] ss:$12 sps:$4 sm:$0xff]   ;;  %v3008_v6 = vld [vmem:[#allocation5 + $0x1a0] ss:$12 sps:$4 sm:$0xff]  }
  0x53   :  { %1112 = vmatprep.subr.bf16.mxu0 %v2883_v31  ;;  %1152 = vmatpush1.bf16.msra.mxu1 %v2882_v32  ;;  %v2954_v30 = vld [vmem:[#allocation5 + $0x330] ss:$12 sps:$4 sm:$0xff]   ;;  %v2963_v32 = vld [vmem:[#allocation5 + $0x38] ss:$12 sps:$4 sm:$0xff]  }
  0x54   :  { %1153 = vmatprep.subr.bf16.mxu1 %v2886_v33  ;;  %v2961_v31 = vld [vmem:[#allocation5 + $0x31c] ss:$12 sps:$4 sm:$0xff]   ;;  %v2967_v33 = vld [vmem:[#allocation5 + $0xe0] ss:$12 sps:$4 sm:$0xff]   ;;  %v2999_v4 = vld [vmem:[#allocation5 + $0x3d8] ss:$12 sps:$4 sm:$0xff]  }
  0x55   :  { %v2978_v46 = vld [vmem:[#allocation5 + $0x230] ss:$12 sps:$4 sm:$0xff]  }
  0x56   :  { %1113 = vmatpush2.bf16.msra.mxu0 %v2885_v34  ;;  %v2959_v34 = vld [vmem:[#allocation5 + $0x318] ss:$12 sps:$4 sm:$0xff]  }
  0x57   :  { %1114 = vmatprep.subr.bf16.mxu0 %v2889_v35  ;;  %1154 = vmatpush2.bf16.msra.mxu1 %v2888_v36  ;;  %v2966_v35 = vld [vmem:[#allocation5 + $0x304] ss:$12 sps:$4 sm:$0xff]   ;;  %v2968_v36 = vld [vmem:[#allocation5 + $0x20] ss:$12 sps:$4 sm:$0xff]  }
  0x58   :  { %1155 = vmatprep.subr.bf16.mxu1 %v2892_v37  ;;  %v2972_v37 = vld [vmem:[#allocation5 + $0xc8] ss:$12 sps:$4 sm:$0xff]  }
  0x5a   :  { %1115 = vmatpush2.bf16.msra.mxu0 %v2891_v38  ;;  %v2964_v38 = vld [vmem:[#allocation5 + $0x300] ss:$12 sps:$4 sm:$0xff]  }
  0x5b   :  { %1116 = vmatprep.subr.bf16.mxu0 %v2895_v39  ;;  %1156 = vmatpush2.bf16.msra.mxu1 %v2894_v40  ;;  %v2971_v39 = vld [vmem:[#allocation5 + $0x46c] ss:$12 sps:$4 sm:$0xff]   ;;  %v2973_v40 = vld [vmem:[#allocation5 + $0x8] ss:$12 sps:$4 sm:$0xff]  }
  0x5c   :  { %1157 = vmatprep.subr.bf16.mxu1 %v2898_v41  ;;  %v2977_v41 = vld [vmem:[#allocation5 + $0x2f0] ss:$12 sps:$4 sm:$0xff]  }
  0x5e   :  { %1117 = vmatpush2.bf16.msra.mxu0 %v2897_v42  ;;  %v86_v42 = vld [vmem:[#allocation2 + $0x28] sm:$0xff] }
  0x5f   :  { %1118 = vmatprep.subr.bf16.mxu0 %v2901_v43  ;;  %1158 = vmatpush2.bf16.msra.mxu1 %v2900_v44  ;;  %v2969_v43 = vld [vmem:[#allocation5 + $0x468] ss:$12 sps:$4 sm:$0xff]   ;;  %v3336_v44 = vpack.c.bf16 %v86_v42, %v86_v42  ;;  %v3026_v42 = vld [vmem:[#allocation5 + $0x3e0] ss:$12 sps:$4 sm:$0xff]  }
  0x60   :  { %1159 = vmatprep.subr.bf16.mxu1 %v2904_v45  ;;  %v2976_v45 = vld [vmem:[#allocation5 + $0x454] ss:$12 sps:$4 sm:$0xff]  }
  0x62   :  { %1119 = vmatpush2.bf16.msra.mxu0 %v2903_v47  ;;  %v2982_v47 = vld [vmem:[#allocation5 + $0x2d8] ss:$12 sps:$4 sm:$0xff]  }
  0x63   :  { %1120 = vmatprep.subr.bf16.mxu0 %v2907_v49  ;;  %1160 = vmatpush2.bf16.msra.mxu1 %v2906_v51  ;;  %v2981_v49 = vld [vmem:[#allocation5 + $0x43c] ss:$12 sps:$4 sm:$0xff]   ;;  %v2987_v51 = vld [vmem:[#allocation5 + $0x2c0] ss:$12 sps:$4 sm:$0xff]  }
  0x64   :  { %1161 = vmatprep.subr.bf16.mxu1 %v2910_v53  ;;  %v2979_v53 = vld [vmem:[#allocation5 + $0x438] ss:$12 sps:$4 sm:$0xff]  }
  0x66   :  { %1121 = vmatpush2.bf16.msra.mxu0 %v2909_v54  ;;  %v2986_v54 = vld [vmem:[#allocation5 + $0x424] ss:$12 sps:$4 sm:$0xff]  }
  0x67   :  { %1122 = vmatprep.subr.bf16.mxu0 %v2913_v55  ;;  %1162 = vmatpush2.bf16.msra.mxu1 %v2912_v56  ;;  %v2988_v55 = vld [vmem:[#allocation5 + $0x200] ss:$12 sps:$4 sm:$0xff]   ;;  %v2992_v56 = vld [vmem:[#allocation5 + $0x2a8] ss:$12 sps:$4 sm:$0xff]  }
  0x68   :  { %1163 = vmatprep.subr.bf16.mxu1 %v2916_v57  ;;  %v2984_v57 = vld [vmem:[#allocation5 + $0x420] ss:$12 sps:$4 sm:$0xff]  }
  0x6a   :  { %1123 = vmatpush2.bf16.msra.mxu0 %v2915_v58  ;;  %v2991_v58 = vld [vmem:[#allocation5 + $0x40c] ss:$12 sps:$4 sm:$0xff]  }
  0x6b   :  { %1124 = vmatprep.subr.bf16.mxu0 %v2919_v59  ;;  %1164 = vmatpush2.bf16.msra.mxu1 %v2918_v60  ;;  %v2993_v59 = vld [vmem:[#allocation5 + $0x1e8] ss:$12 sps:$4 sm:$0xff]   ;;  %v2997_v60 = vld [vmem:[#allocation5 + $0x290] ss:$12 sps:$4 sm:$0xff]  }
  0x6c   :  { %1165 = vmatprep.subr.bf16.mxu1 %v2922_v61  ;;  %v2996_v61 = vld [vmem:[#allocation5 + $0x3f4] ss:$12 sps:$4 sm:$0xff]  }
  0x6e   :  { %1125 = vmatpush2.bf16.msra.mxu0 %v2921_v62  ;;  %v2994_v62 = vld [vmem:[#allocation5 + $0x3f0] ss:$12 sps:$4 sm:$0xff]  }
  0x6f   :  { %1126 = vmatprep.subr.bf16.mxu0 %v2925_v0  ;;  %1166 = vmatpush2.bf16.msra.mxu1 %v2924_v63  ;;  %v2998_v63 = vld [vmem:[#allocation5 + $0x1d0] ss:$12 sps:$4 sm:$0xff]   ;;  %v3002_v0 = vld [vmem:[#allocation5 + $0x278] ss:$12 sps:$4 sm:$0xff]  }
  0x70   :  { %1167 = vmatprep.subr.bf16.mxu1 %v2928_v2  ;;  %v3003_v2 = vld [vmem:[#allocation5 + $0x1b8] ss:$12 sps:$4 sm:$0xff]  }
  0x72   :  { %1127 = vmatpush2.bf16.msra.mxu0 %v2927_v1  ;;  %v3001_v1 = vld [vmem:[#allocation5 + $0x3dc] ss:$12 sps:$4 sm:$0xff]  }
  0x73   :  { %1178 = vmatprep.subr.bf16.mxu0 %v2933_v5  ;;  %1168 = vmatpush2.bf16.msra.mxu1 %v2930_v3  ;;  %v3007_v3 = vld [vmem:[#allocation5 + $0x260] ss:$12 sps:$4 sm:$0xff]   ;;  %v3006_v5 = vld [vmem:[#allocation5 + $0x3c4] ss:$12 sps:$4 sm:$0xff]  }
  0x74   :  { %2647 = vmatprep.subr.bf16.mxu1 %v2937_v8  ;;  %v3004_v8 = vld [vmem:[#allocation5 + $0x3c0] ss:$12 sps:$4 sm:$0xff]  }
  0x75   :  { %1129 = vmatmul.mubr.bf16.vlgmr.msra.gmra.mxu0 %v3330_v7 }
  0x76   :  { %1179 = vmatpush1.bf16.msra.mxu0 %v2931_v9  ;;  %1170 = vmatmul.mubr.bf16.vlgmr.msra.gmra.mxu1 %v3332_v10  ;;  %v85_v9 = vld [vmem:[#allocation2 + $0x20] sm:$0xff] }
  0x77   :  { %1180 = vmatprep.subr.bf16.mxu0 %v2936_v11  ;;  %2648 = vmatpush3.bf16.msra.mxu1 %v2938_v12  ;;  %v3011_v11 = vld [vmem:[#allocation5 + $0x484] ss:$12 sps:$4 sm:$0xff]   ;;  %v3013_v12 = vld [vmem:[#allocation5 + $0x188] ss:$12 sps:$4 sm:$0xff]  }
  0x78   :  { %1292 = vmatprep.mubr.bf16.mxu1 %v89_v48  ;;  %2649 = vmatprep.subr.bf16.mxu1 %v2942_v13  ;;  %v2974_v48 = vld [vmem:[#allocation5 + $0x450] ss:$12 sps:$4 sm:$0xff]   ;;  %v3009_v13 = vld [vmem:[#allocation5 + $0x480] ss:$12 sps:$4 sm:$0xff]  }
  0x79   :  { %1210 = vmatprep.mubr.bf16.mxu0 %v3336_v44 }
  0x7a   :  { %1181 = vmatpush1.bf16.msra.mxu0 %v2934_v14  ;;  %v3341_v14 = vpack.c.bf16 %v85_v9, %v85_v9  ;;  %v3093_v9 = vld [vmem:[#allocation7 + $0x1e4] ss:$12 sps:$4 sm:$0xff]  }
  0x7b   :  { %1182 = vmatprep.subr.bf16.mxu0 %v2941_v15  ;;  %2650 = vmatpush3.bf16.msra.mxu1 %v2943_v16  ;;  %v3014_v15 = vld [vmem:[#allocation5 + $0x470] ss:$12 sps:$4 sm:$0xff]   ;;  %v3030_v16 = vld [vmem:[#allocation5 + $0x488] ss:$12 sps:$4 sm:$0xff]  }
  0x7c   :  { %2651 = vmatprep.subr.bf16.mxu1 %v2947_v17  ;;  %v87_v17 = vld [vmem:[#allocation2 + $0x30] sm:$0xff] }
  0x7e   :  { %1183 = vmatpush1.bf16.msra.mxu0 %v2939_v18  ;;  %v3271_v18 = vmov 0.0  }
  0x7f   :  { %1184 = vmatprep.subr.bf16.mxu0 %v2946_v19  ;;  %2652 = vmatpush3.bf16.msra.mxu1 %v2948_v20  ;;  %v3272_v19 = vmov 0   ;;  %v3015_v20 = vld [vmem:[#allocation5 + $0x3b0] ss:$12 sps:$4 sm:$0xff]  }
  0x80   :  { %2653 = vmatprep.subr.bf16.mxu1 %v2952_v21  ;;  %v94_v21 = vpack.c.bf16 %v87_v17, %v87_v17  ;;  %v3103_v17 = vld [vmem:[#allocation7 + $0x198] ss:$12 sps:$4 sm:$0xff]  }
  0x82   :  { %1185 = vmatpush1.bf16.msra.mxu0 %v2944_v22  ;;  %v3016_v22 = vld [vmem:[#allocation5 + $0x458] ss:$12 sps:$4 sm:$0xff]  }
  0x83   :  { %1186 = vmatprep.subr.bf16.mxu0 %v2951_v23  ;;  %2654 = vmatpush3.bf16.msra.mxu1 %v2953_v24  ;;  %v3033_v23 = vld [vmem:[#allocation7 + $0xac] ss:$12 sps:$4 sm:$0xff]   ;;  %v3031_v24 = vld [vmem:[#allocation7 + $0xa8] ss:$12 sps:$4 sm:$0xff]  }
  0x84   :  { %2655 = vmatprep.subr.bf16.mxu1 %v2957_v25  ;;  %v3036_v25 = vld [vmem:[#allocation7 + $0x94] ss:$12 sps:$4 sm:$0xff]  }
  0x86   :  { %1187 = vmatpush1.bf16.msra.mxu0 %v2949_v26  ;;  %v3017_v26 = vld [vmem:[#allocation5 + $0x398] ss:$12 sps:$4 sm:$0xff]  }
  0x87   :  { %1188 = vmatprep.subr.bf16.mxu0 %v2956_v27  ;;  %2656 = vmatpush3.bf16.msra.mxu1 %v2958_v28  ;;  %v3034_v27 = vld [vmem:[#allocation7 + $0x90] ss:$12 sps:$4 sm:$0xff]   ;;  %v3019_v28 = vld [vmem:[#allocation5 + $0x380] ss:$12 sps:$4 sm:$0xff]  }
  0x88   :  { %2657 = vmatprep.subr.bf16.mxu1 %v2962_v29  ;;  %v3020_v29 = vld [vmem:[#allocation5 + $0x428] ss:$12 sps:$4 sm:$0xff]  }
  0x8a   :  { %1189 = vmatpush1.bf16.msra.mxu0 %v2954_v30  ;;  %v3039_v30 = vld [vmem:[#allocation7 + $0x7c] ss:$12 sps:$4 sm:$0xff]  }
  0x8b   :  { %1190 = vmatprep.subr.bf16.mxu0 %v2961_v31  ;;  %2658 = vmatpush3.bf16.msra.mxu1 %v2963_v32  ;;  %v3037_v31 = vld [vmem:[#allocation7 + $0x78] ss:$12 sps:$4 sm:$0xff]  }
  0x8c   :  { %2659 = vmatprep.subr.bf16.mxu1 %v2967_v33  ;;  %v3042_v32 = vld [vmem:[#allocation7 + $0x64] ss:$12 sps:$4 sm:$0xff]  }
  0x8d   :  { %v3021_v33 = vld [vmem:[#allocation5 + $0x368] ss:$12 sps:$4 sm:$0xff]  }
  0x8e   :  { %1191 = vmatpush1.bf16.msra.mxu0 %v2959_v34  ;;  %v3022_v34 = vld [vmem:[#allocation5 + $0x410] ss:$12 sps:$4 sm:$0xff]  }
  0x8f   :  { %1192 = vmatprep.subr.bf16.mxu0 %v2966_v35  ;;  %2660 = vmatpush3.bf16.msra.mxu1 %v2968_v36  ;;  %v3040_v35 = vld [vmem:[#allocation7 + $0x60] ss:$12 sps:$4 sm:$0xff]  }
  0x90   :  { %2661 = vmatprep.subr.bf16.mxu1 %v2972_v37  ;;  %v3045_v36 = vld [vmem:[#allocation7 + $0x4c] ss:$12 sps:$4 sm:$0xff]  }
  0x91   :  { %v3023_v37 = vld [vmem:[#allocation5 + $0x350] ss:$12 sps:$4 sm:$0xff]  }
  0x92   :  { %1193 = vmatpush1.bf16.msra.mxu0 %v2964_v38  ;;  %v3024_v38 = vld [vmem:[#allocation5 + $0x3f8] ss:$12 sps:$4 sm:$0xff]  }
  0x93   :  { %1194 = vmatprep.subr.bf16.mxu0 %v2971_v39  ;;  %2662 = vmatpush3.bf16.msra.mxu1 %v2973_v40  ;;  %v3043_v39 = vld [vmem:[#allocation7 + $0x48] ss:$12 sps:$4 sm:$0xff]  }
  0x94   :  { %2669 = vmatprep.subr.bf16.mxu1 %v2977_v41  ;;  %v3048_v40 = vld [vmem:[#allocation7 + $0x34] ss:$12 sps:$4 sm:$0xff]  }
  0x95   :  { %v3025_v41 = vld [vmem:[#allocation5 + $0x338] ss:$12 sps:$4 sm:$0xff]  }
  0x96   :  { %1195 = vmatpush2.bf16.msra.mxu0 %v2969_v43  ;;  %1293 = vmatmul.mubr.bf16.vlgmr.msra.gmra.mxu1 %v3330_v7  ;;  %v3012_v7 = vld [vmem:[#allocation5 + $0x248] ss:$12 sps:$4 sm:$0xff]  }
  0x97   :  { %1196 = vmatprep.subr.bf16.mxu0 %v2976_v45  ;;  %2670 = vmatpush3.bf16.msra.mxu1 %v2978_v46  ;;  %v3046_v43 = vld [vmem:[#allocation7 + $0x30] ss:$12 sps:$4 sm:$0xff]   ;;  %v3027_v45 = vld [vmem:[#allocation5 + $0x320] ss:$12 sps:$4 sm:$0xff]  }
  0x98   :  { %1332 = vmatprep.mubr.bf16.mxu1 %v3327_v52  ;;  %2671 = vmatprep.subr.bf16.mxu1 %v2982_v47  ;;  %v2989_v52 = vld [vmem:[#allocation5 + $0x408] ss:$12 sps:$4 sm:$0xff]   ;;  %v3049_v47 = vld [vmem:[#allocation7 + $0x18] ss:$12 sps:$4 sm:$0xff]  }
  0x99   :  { %v3028_v46 = vld [vmem:[#allocation5 + $0x3c8] ss:$12 sps:$4 sm:$0xff]  }
  0x9a   :  { %1197 = vmatpush2.bf16.msra.mxu0 %v2974_v48  ;;  %v3054_v48 = vld [vmem:[#allocation7 + $0x4] ss:$12 sps:$4 sm:$0xff]  }
  0x9b   :  { %1198 = vmatprep.subr.bf16.mxu0 %v2981_v49  ;;  %2672 = vmatpush3.bf16.msra.mxu1 %v2983_v50  ;;  %v3029_v49 = vld [vmem:[#allocation5 + $0x308] ss:$12 sps:$4 sm:$0xff]   ;;  %v3052_v50 = vld [vmem:[#allocation7] ss:$12 sps:$4 sm:$0xff]  }
  0x9c   :  { %2673 = vmatprep.subr.bf16.mxu1 %v2987_v51  ;;  %v3057_v51 = vld [vmem:[#allocation7 + $0x16c] ss:$12 sps:$4 sm:$0xff]  }
  0x9e   :  { %1199 = vmatpush2.bf16.msra.mxu0 %v2979_v53  ;;  %v3055_v53 = vld [vmem:[#allocation7 + $0x168] ss:$12 sps:$4 sm:$0xff]  }
  0x9f   :  { %1200 = vmatprep.subr.bf16.mxu0 %v2986_v54  ;;  %2674 = vmatpush3.bf16.msra.mxu1 %v2988_v55  ;;  %v3060_v54 = vld [vmem:[#allocation7 + $0x154] ss:$12 sps:$4 sm:$0xff]   ;;  %v3058_v55 = vld [vmem:[#allocation7 + $0x150] ss:$12 sps:$4 sm:$0xff]  }
  0xa0   :  { %2675 = vmatprep.subr.bf16.mxu1 %v2992_v56  ;;  %v3063_v56 = vld [vmem:[#allocation7 + $0x13c] ss:$12 sps:$4 sm:$0xff]  }
  0xa2   :  { %1201 = vmatpush2.bf16.msra.mxu0 %v2984_v57  ;;  %v3061_v57 = vld [vmem:[#allocation7 + $0x138] ss:$12 sps:$4 sm:$0xff]  }
  0xa3   :  { %1202 = vmatprep.subr.bf16.mxu0 %v2991_v58  ;;  %2676 = vmatpush3.bf16.msra.mxu1 %v2993_v59  ;;  %v3066_v58 = vld [vmem:[#allocation7 + $0x124] ss:$12 sps:$4 sm:$0xff]   ;;  %v3064_v59 = vld [vmem:[#allocation7 + $0x120] ss:$12 sps:$4 sm:$0xff]  }
  0xa4   :  { %2677 = vmatprep.subr.bf16.mxu1 %v2997_v60  ;;  %v3069_v60 = vld [vmem:[#allocation7 + $0x10c] ss:$12 sps:$4 sm:$0xff]  }
  0xa6   :  { %1203 = vmatpush2.bf16.msra.mxu0 %v2989_v52  ;;  %v3067_v52 = vld [vmem:[#allocation7 + $0x108] ss:$12 sps:$4 sm:$0xff]  }
  0xa7   :  { %1204 = vmatprep.subr.bf16.mxu0 %v2996_v61  ;;  %2678 = vmatpush3.bf16.msra.mxu1 %v2998_v63  ;;  %v3072_v61 = vld [vmem:[#allocation7 + $0xf4] ss:$12 sps:$4 sm:$0xff]   ;;  %v3075_v63 = vld [vmem:[#allocation7 + $0xdc] ss:$12 sps:$4 sm:$0xff]  }
  0xa8   :  { %2679 = vmatprep.subr.bf16.mxu1 %v3002_v0  ;;  %v3073_v0 = vld [vmem:[#allocation7 + $0xd8] ss:$12 sps:$4 sm:$0xff]  }
  0xaa   :  { %1205 = vmatpush2.bf16.msra.mxu0 %v2994_v62  ;;  %v3070_v62 = vld [vmem:[#allocation7 + $0xf0] ss:$12 sps:$4 sm:$0xff]  }
  0xab   :  { %1206 = vmatprep.subr.bf16.mxu0 %v3001_v1  ;;  %2680 = vmatpush3.bf16.msra.mxu1 %v3003_v2  ;;  %v3078_v1 = vld [vmem:[#allocation7 + $0xc4] ss:$12 sps:$4 sm:$0xff]   ;;  %v3076_v2 = vld [vmem:[#allocation7 + $0xc0] ss:$12 sps:$4 sm:$0xff]  }
  0xac   :  { %2681 = vmatprep.subr.bf16.mxu1 %v3007_v3  ;;  %v3079_v3 = vld [vmem:[#allocation7 + $0x228] ss:$12 sps:$4 sm:$0xff]  }
  0xae   :  { %1207 = vmatpush2.bf16.msra.mxu0 %v2999_v4  ;;  %v3081_v4 = vld [vmem:[#allocation7 + $0x22c] ss:$12 sps:$4 sm:$0xff]  }
  0xaf   :  { %1208 = vmatprep.subr.bf16.mxu0 %v3006_v5  ;;  %2682 = vmatpush3.bf16.msra.mxu1 %v3008_v6  ;;  %v3085_v5 = vld [vmem:[#allocation7 + $0x214] ss:$12 sps:$4 sm:$0xff]   ;;  %v3083_v6 = vld [vmem:[#allocation7 + $0x210] ss:$12 sps:$4 sm:$0xff]  }
  0xb0   :  { %2683 = vmatprep.subr.bf16.mxu1 %v3012_v7  ;;  %v3089_v7 = vld [vmem:[#allocation7 + $0x1fc] ss:$12 sps:$4 sm:$0xff]  }
  0xb2   :  { %1209 = vmatpush2.bf16.msra.mxu0 %v3004_v8  ;;  %v3087_v8 = vld [vmem:[#allocation7 + $0x1f8] ss:$12 sps:$4 sm:$0xff]  }
  0xb3   :  { %1233 = vmatprep.subr.bf16.mxu0 %v3011_v11  ;;  %2684 = vmatpush3.bf16.msra.mxu1 %v3013_v12  ;;  %v3091_v11 = vld [vmem:[#allocation7 + $0x1e0] ss:$12 sps:$4 sm:$0xff]  }
  0xb4   :  { %2777 = vmatprep.subr.bf16.mxu1 %v3271_v18  ;;  %v3097_v12 = vld [vmem:[#allocation7 + $0x1cc] ss:$12 sps:$4 sm:$0xff]  }
  0xb5   :  { %1211 = vmatmul.mubr.bf16.vlgmr.msra.gmra.mxu0 %v3341_v14 }
  0xb6   :  { %1234 = vmatpush1.bf16.msra.mxu0 %v3009_v13  ;;  %1251 = vmatprep.mubr.bf16.mxu0 %v3272_v19  ;;  %v3095_v13 = vld [vmem:[#allocation7 + $0x1c8] ss:$12 sps:$4 sm:$0xff]  }
  0xb7   :  { %1333 = vmatmul.mubr.bf16.vlgmr.msra.gmra.mxu1 %v3332_v10  ;;  %2691 = vmatprep.subr.bf16.mxu0 %v3014_v15  ;;  %v3018_v10 = vld [vmem:[#allocation5 + $0x440] ss:$12 sps:$4 sm:$0xff]   ;;  %v3099_v15 = vld [vmem:[#allocation7 + $0x1b0] ss:$12 sps:$4 sm:$0xff]  }
  0xb8   :  { %2778 = vmatpush3.bf16.msra.mxu1 %v3030_v16  ;;  %2779 = vmatprep.mubr.msk.bf16.mxu1 %vm3273_vm0, %v3271_v18  ;;  %v3105_v16 = vld [vmem:[#allocation7 + $0x19c] ss:$12 sps:$4 sm:$0xff]  }
  0xb9   :  { %1923 = vmatprep.subr.bf16.mxu1 %v3033_v23 }
  0xbd   :  { %2548 = vmatmul.mubr.msk.bf16.vlgmr.msra.gmra.mxu0 %vm1092_vm1, %v94_v21 }
  0xbe   :  { %2692 = vmatpush3.bf16.msra.mxu0 %v3015_v20  ;;  %1372 = vmatprep.mubr.bf16.mxu0 %v3336_v44  ;;  %v3051_v44 = vld [vmem:[#allocation7 + $0x1c] ss:$12 sps:$4 sm:$0xff]   ;;  %v3107_v20 = vld [vmem:[#allocation7 + $0x180] ss:$12 sps:$4 sm:$0xff]  }
  0xbf   :  { %2693 = vmatprep.subr.bf16.mxu0 %v3016_v22  ;;  %2780 = vmatmul.mubr.msk.bf16.vlgmr.msra.gmra.mxu1 %vm1092_vm1, %v94_v21  ;;  %v293_v21 = vlaneseq  ;;  %v3111_v22 = vld [vmem:[#allocation7 + $0x170] ss:$12 sps:$4 sm:$0xff]  }
  0xc0   :  { %1924 = vmatpush1.bf16.msra.mxu1 %v3031_v24 }
  0xc1   :  { %1925 = vmatprep.subr.bf16.mxu1 %v3036_v25  ;;  %v3354_v23 = vshrl.u32 %v293_v21, 7  ;;  %v291_v25 = vld [vmem:[%s3409_s2] sm:$0x7] }
  0xc2   :  { %2694 = vmatpush3.bf16.msra.mxu0 %v3017_v26 }
  0xc3   :  { %2695 = vmatprep.subr.bf16.mxu0 %v3018_v10  ;;  %v295_v24 = vsub.s32 0, %v3354_v23  ;;  %v299_v26 = vsub.s32 1, %v3354_v23 }
  0xc4   :  { %1926 = vmatpush1.bf16.msra.mxu1 %v3034_v27 }
  0xc5   :  { %1927 = vmatprep.subr.bf16.mxu1 %v3039_v30  ;;  %v296_v10 = vrot.slane %v291_v25, %v295_v24  ;;  %v300_v27 = vrot.slane %v291_v25, %v299_v26 }
  0xc6   :  { %2696 = vmatpush3.bf16.msra.mxu0 %v3019_v28 }
  0xc7   :  { %2697 = vmatprep.subr.bf16.mxu0 %v3020_v29 }
  0xc8   :  { %1928 = vmatpush1.bf16.msra.mxu1 %v3037_v31 }
  0xc9   :  { %1929 = vmatprep.subr.bf16.mxu1 %v3042_v32 }
  0xca   :  { %2698 = vmatpush3.bf16.msra.mxu0 %v3021_v33 }
  0xcb   :  { %2699 = vmatprep.subr.bf16.mxu0 %v3022_v34 }
  0xcc   :  { %1930 = vmatpush1.bf16.msra.mxu1 %v3040_v35 }
  0xcd   :  { %1931 = vmatprep.subr.bf16.mxu1 %v3045_v36 }
  0xce   :  { %2700 = vmatpush3.bf16.msra.mxu0 %v3023_v37 }
  0xcf   :  { %2701 = vmatprep.subr.bf16.mxu0 %v3024_v38 }
  0xd0   :  { %1932 = vmatpush1.bf16.msra.mxu1 %v3043_v39 }
  0xd1   :  { %1933 = vmatprep.subr.bf16.mxu1 %v3048_v40 }
  0xd2   :  { %2702 = vmatpush3.bf16.msra.mxu0 %v3025_v41 }
  0xd3   :  { %2703 = vmatprep.subr.bf16.mxu0 %v3026_v42 }
  0xd4   :  { %1934 = vmatpush1.bf16.msra.mxu1 %v3046_v43 }
  0xd5   :  { %1935 = vmatprep.subr.bf16.mxu1 %v3051_v44 }
  0xd6   :  { %2704 = vmatpush3.bf16.msra.mxu0 %v3027_v45 }
  0xd7   :  { %2705 = vmatprep.subr.bf16.mxu0 %v3028_v46 }
  0xd8   :  { %1936 = vmatpush1.bf16.msra.mxu1 %v3049_v47 }
  0xd9   :  { %1937 = vmatprep.subr.bf16.mxu1 %v3054_v48 }
  0xda   :  { %2706 = vmatpush3.bf16.msra.mxu0 %v3029_v49 }
  0xdb   :  { %1964 = vmatprep.subr.bf16.mxu0 %v3081_v4 }
  0xdc   :  { %1938 = vmatpush1.bf16.msra.mxu1 %v3052_v50 }
  0xdd   :  { %1373 = vmatmul.mubr.bf16.vlgmr.msra.gmra.mxu0 %v3341_v14  ;;  %1939 = vmatprep.subr.bf16.mxu1 %v3057_v51  ;;  %v3101_v14 = vld [vmem:[#allocation7 + $0x1b4] ss:$12 sps:$4 sm:$0xff]  }
  0xde   :  { %1996 = vmatprep.mubr.bf16.mxu0 %v3272_v19  ;;  %1965 = vmatpush1.bf16.msra.mxu0 %v3079_v3  ;;  %v3109_v19 = vld [vmem:[#allocation7 + $0x184] ss:$12 sps:$4 sm:$0xff]  }
  0xdf   :  { %1966 = vmatprep.subr.bf16.mxu0 %v3085_v5  ;;  %v3082_v3 = vld [vmem:[#allocation7 + $0x230] ss:$12 sps:$4 sm:$0xff]  }
  0xe0   :  { %1940 = vmatpush2.bf16.msra.mxu1 %v3055_v53 }
  0xe1   :  { %1941 = vmatprep.subr.bf16.mxu1 %v3060_v54 }
  0xe2   :  { %1967 = vmatpush1.bf16.msra.mxu0 %v3083_v6  ;;  %v3086_v6 = vld [vmem:[#allocation7 + $0x218] ss:$12 sps:$4 sm:$0xff]  }
  0xe3   :  { %1968 = vmatprep.subr.bf16.mxu0 %v3089_v7  ;;  %v3090_v7 = vld [vmem:[#allocation7 + $0x200] ss:$12 sps:$4 sm:$0xff]  }
  0xe4   :  { %1942 = vmatpush2.bf16.msra.mxu1 %v3058_v55 }
  0xe5   :  { %1943 = vmatprep.subr.bf16.mxu1 %v3063_v56 }
  0xe6   :  { %1969 = vmatpush1.bf16.msra.mxu0 %v3087_v8  ;;  %v3094_v8 = vld [vmem:[#allocation7 + $0x1e8] ss:$12 sps:$4 sm:$0xff]  }
  0xe7   :  { %1970 = vmatprep.subr.bf16.mxu0 %v3093_v9  ;;  %v303_v9 = vsub.s32 2, %v3354_v23  ;;  %v2371_v23 = vand.u32 127, %v293_v21 }
  0xe8   :  { %1944 = vmatpush2.bf16.msra.mxu1 %v3061_v57 }
  0xe9   :  { %1945 = vmatprep.subr.bf16.mxu1 %v3066_v58  ;;  %vm2372_vm2 = vcmp.lt.s32.totalorder %v2371_v23, 10 }
  0xea   :  { %1971 = vmatpush1.bf16.msra.mxu0 %v3091_v11  ;;  %v3098_v11 = vld [vmem:[#allocation7 + $0x1d0] ss:$12 sps:$4 sm:$0xff]  }
  0xeb   :  { %1972 = vmatprep.subr.bf16.mxu0 %v3097_v12  ;;  %v304_v12 = vrot.slane %v291_v25, %v303_v9 }
  0xec   :  { %1946 = vmatpush2.bf16.msra.mxu1 %v3064_v59 }
  0xed   :  { %1947 = vmatprep.subr.bf16.mxu1 %v3069_v60 }
  0xee   :  { %1973 = vmatpush1.bf16.msra.mxu0 %v3095_v13  ;;  %v3102_v13 = vld [vmem:[#allocation7 + $0x1b8] ss:$12 sps:$4 sm:$0xff]  }
  0xef   :  { %1974 = vmatprep.subr.bf16.mxu0 %v3101_v14 }
  0xf0   :  { %1948 = vmatpush2.bf16.msra.mxu1 %v3067_v52 }
  0xf1   :  { %1949 = vmatprep.subr.bf16.mxu1 %v3072_v61 }
  0xf2   :  { %1975 = vmatpush1.bf16.msra.mxu0 %v3099_v15 }
  0xf3   :  { %1976 = vmatprep.subr.bf16.mxu0 %v3105_v16  ;;  %v3106_v16 = vld [vmem:[#allocation7 + $0x1a0] ss:$12 sps:$4 sm:$0xff]  }
  0xf4   :  { %1950 = vmatpush2.bf16.msra.mxu1 %v3070_v62 }
  0xf5   :  { %1951 = vmatprep.subr.bf16.mxu1 %v3075_v63 }
  0xf6   :  { %1977 = vmatpush1.bf16.msra.mxu0 %v3103_v17 }
  0xf7   :  { %1978 = vmatprep.subr.bf16.mxu0 %v3109_v19 }
  0xf8   :  { %1952 = vmatpush2.bf16.msra.mxu1 %v3073_v0 }
  0xf9   :  { %1953 = vmatprep.subr.bf16.mxu1 %v3078_v1 }
  0xfa   :  { %1979 = vmatpush1.bf16.msra.mxu0 %v3107_v20 }
  0xfb   :  { %2715 = vmatprep.subr.bf16.mxu0 %v3111_v22 }
  0xfc   :  { %1954 = vmatpush2.bf16.msra.mxu1 %v3076_v2 }
  0xfd   :  { %2783 = vmatprep.subr.bf16.mxu1 %v3271_v18 }
 0x135   :  { %v1130_v28 = vpop.f32.mrf.mxu0 }
 0x136   :  { %v1131_v29 = vadd.f32 %v1130_v28, %v296_v10  ;;  %v1171_v31 = vpop.f32.mrf.mxu1  ;;  %v3110_v10 = vld [vmem:[#allocation7 + $0x188] ss:$12 sps:$4 sm:$0xff]  }
 0x137   :  { %v1132_v30 = vpop.f32.mrf.mxu0 }
 0x138   :  { %v1133_v32 = vadd.f32 %v1132_v30, %v300_v27  ;;  %v1172_v33 = vadd.f32 %v1171_v31, %v1131_v29  ;;  %v1173_v35 = vpop.f32.mrf.mxu1  ;;  %v3112_v31 = vld [vmem:[#allocation7 + $0xb0] ss:$12 sps:$4 sm:$0xff]  }
 0x139   :  { %v1134_v34 = vpop.f32.mrf.mxu0 }
 0x13a   :  { %v1174_v36 = vadd.f32 %v1173_v35, %v1133_v32  ;;  %v1175_v38 = vpop.f32.mrf.mxu1  ;;  %v3114_v34 = vld [vmem:[#allocation7 + $0x98] ss:$12 sps:$4 sm:$0xff]   ;;  %v3115_v35 = vld [vmem:[#allocation7 + $0x140] ss:$12 sps:$4 sm:$0xff]  }
 0x13b   :  { %v1135_v37 = vpop.f32.mrf.mxu0  ;;  %v3118_v38 = vld [vmem:[#allocation7 + $0x68] ss:$12 sps:$4 sm:$0xff]  }
 0x13c   :  { %v1176_v39 = vpop.f32.mrf.mxu1  ;;  %v3117_v37 = vld [vmem:[#allocation7 + $0x128] ss:$12 sps:$4 sm:$0xff]  }
 0x13d   :  { %v3119_v39 = vld [vmem:[#allocation7 + $0x110] ss:$12 sps:$4 sm:$0xff]  }
 0x156   :  { %v2663_v40 = vpop.f32.mrf.mxu1 }
 0x158   :  { %v2664_v41 = vpop.f32.mrf.mxu1 }
 0x159   :  { %v2665_v42 = vadd.f32 %v2664_v41, %v2663_v40  ;;  %v3120_v40 = vld [vmem:[#allocation7 + $0x50] ss:$12 sps:$4 sm:$0xff]   ;;  %v3121_v41 = vld [vmem:[#allocation7 + $0xf8] ss:$12 sps:$4 sm:$0xff]  }
 0x15a   :  { %v2666_v43 = vpop.f32.mrf.mxu1 }
 0x15b   :  { %v1295_v14 = vadd.f32 %v2665_v42, %v304_v12  ;;  %v3122_v42 = vld [vmem:[#allocation7 + $0x38] ss:$12 sps:$4 sm:$0xff]   ;;  %v3123_v43 = vld [vmem:[#allocation7 + $0xe0] ss:$12 sps:$4 sm:$0xff]  }
 0x15c   :  { %v2667_v44 = vpop.f32.mrf.mxu1 }
 0x15d   :  { %v3124_v44 = vld [vmem:[#allocation7 + $0x20] ss:$12 sps:$4 sm:$0xff]  }
 0x175   :  { %v1212_v45 = vpop.f32.mrf.mxu0 }
 0x176   :  { %v1213_v53 = vadd.f32 %v1212_v45, %v1172_v33  ;;  %v3113_v33 = vld [vmem:[#allocation7 + $0x158] ss:$12 sps:$4 sm:$0xff]   ;;  %v3125_v45 = vld [vmem:[#allocation7 + $0xc8] ss:$12 sps:$4 sm:$0xff]  }
 0x177   :  { %v1214_v46 = vpop.f32.mrf.mxu0  ;;  %v2685_v47 = vpop.f32.mrf.mxu1 }
 0x178   :  { %v1215_v56 = vadd.f32 %v1214_v46, %v1174_v36  ;;  %v3116_v36 = vld [vmem:[#allocation7 + $0x80] ss:$12 sps:$4 sm:$0xff]   ;;  %v3126_v46 = vld [vmem:[#allocation7 + $0x8] ss:$12 sps:$4 sm:$0xff]  }
 0x179   :  { %v1216_v48 = vpop.f32.mrf.mxu0  ;;  %v2686_v49 = vpop.f32.mrf.mxu1 }
 0x17a   :  { %v2687_v15 = vadd.f32 %v2686_v49, %v2685_v47  ;;  %v3127_v47 = vld [vmem:[#allocation8 + $0x78] sm:$0xff]   ;;  %v3129_v49 = vld [vmem:[#allocation8 + $0x70] sm:$0xff]  }
 0x17b   :  { %v1217_v50 = vpop.f32.mrf.mxu0  ;;  %v2688_v51 = vpop.f32.mrf.mxu1  ;;  %v3128_v48 = vld [vmem:[#allocation8 + $0x38] sm:$0xff]  }
 0x17c   :  { %v1335_v20 = vadd.f32 %v2687_v15, %v1295_v14  ;;  %v3130_v50 = vld [vmem:[#allocation8 + $0x30] sm:$0xff]   ;;  %v3131_v51 = vld [vmem:[#allocation8 + $0x68] sm:$0xff]  }
 0x17d   :  { %v1253_v54 = vpop.f32.mrf.mxu0  ;;  %v2689_v55 = vpop.f32.mrf.mxu1 }
 0x17e   :  { %v1254_v57 = vadd.f32 %v1253_v54, %v1213_v53  ;;  %v3132_v53 = vld [vmem:[#allocation8 + $0x28] sm:$0xff]   ;;  %v3133_v54 = vld [vmem:[#allocation8 + $0x60] sm:$0xff]  }
 0x17f   :  { %v1255_v58 = vpop.f32.mrf.mxu0  ;;  %v1414_v59 = vpop.f32.mrf.mxu1  ;;  %v3134_v55 = vld [vmem:[#allocation8 + $0x20] sm:$0xff]  }
 0x180   :  { %v1256_v60 = vadd.f32 %v1255_v58, %v1215_v56  ;;  %v1420_v52 = vmax.f32 %v1254_v57, 0.0  ;;  %v3135_v56 = vld [vmem:[#allocation8 + $0x58] sm:$0xff]   ;;  %v3137_v58 = vld [vmem:[#allocation8 + $0x50] sm:$0xff]  }
 0x181   :  { %v1257_v61 = vpop.f32.mrf.mxu0  ;;  %v2781_v62 = vpop.f32.mrf.mxu1  ;;  %v3136_v57 = vld [vmem:[#allocation8 + $0x18] sm:$0xff]  }
 0x182   :  { %v1421_v63 = vmax.f32 %v1256_v60, 0.0  ;;  %v3365_v4 = vpack.c.bf16 %v1420_v52, %v1420_v52  ;;  %v3139_v60 = vld [vmem:[#allocation8 + $0x48] sm:$0xff]   ;;  %v3141_v61 = vld [vmem:[#allocation8 + $0x40] sm:$0xff]  }
 0x183   :  { %v1258_v0 = vpop.f32.mrf.mxu0  ;;  %v1417_v1 = vpop.f32.mrf.mxu1  ;;  %v3140_v52 = vld [vmem:[#allocation8 + $0x8] sm:$0xff]   ;;  %v3142_v62 = vld [vmem:[#allocation8] sm:$0xff]  }
 0x184   :  { %v1424_v2 = vpack.c.bf16 %v1421_v63, %v1421_v63  ;;  %v3143_v63 = vld [vmem:[#allocation8 + $0xb8] sm:$0xff]   ;;  %v3144_v0 = vld [vmem:[#allocation8 + $0xb0] sm:$0xff]   ;;  %v3145_v1 = vld [vmem:[#allocation8 + $0xa8] sm:$0xff]  }
 0x185   :  { %v2782_v5 = vpop.f32.mrf.mxu1 }
 0x186   :  { %1955 = vmatprep.mubr.bf16.mxu1 %v1424_v2  ;;  %v3149_v5 = vld [vmem:[#allocation8 + $0x88] sm:$0xff]  }
 0x187   :  { %1956 = vmatmul.mubr.bf16.vlgmr.msra.gmra.mxu1 %v3365_v4 }
 0x188   :  { %2784 = vmatpush3.bf16.msra.mxu1 %v3082_v3  ;;  %2799 = vmatprep.mubr.msk.bf16.mxu1 %vm3273_vm0, %v3271_v18  ;;  %v3147_v3 = vld [vmem:[#allocation8 + $0x98] sm:$0xff]  }
 0x189   :  { %2785 = vmatprep.subr.bf16.mxu1 %v3271_v18 }
 0x18c   :  { %2786 = vmatpush3.bf16.msra.mxu1 %v3086_v6  ;;  %v3150_v6 = vld [vmem:[#allocation8 + $0x80] sm:$0xff]  }
 0x18d   :  { %2787 = vmatprep.subr.bf16.mxu1 %v3271_v18 }
 0x190   :  { %2788 = vmatpush3.bf16.msra.mxu1 %v3090_v7 }
 0x191   :  { %2789 = vmatprep.subr.bf16.mxu1 %v3271_v18 }
 0x194   :  { %2790 = vmatpush3.bf16.msra.mxu1 %v3094_v8 }
 0x195   :  { %2791 = vmatprep.subr.bf16.mxu1 %v3271_v18 }
 0x198   :  { %2792 = vmatpush3.bf16.msra.mxu1 %v3098_v11 }
 0x199   :  { %2793 = vmatprep.subr.bf16.mxu1 %v3271_v18 }
 0x19c   :  { %2794 = vmatpush3.bf16.msra.mxu1 %v3102_v13  ;;  %v1522_v13 = vld [vmem:[%s3411_s4] sm:$0x7] }
 0x19d   :  { %v2707_v17 = vpop.f32.mrf.mxu0  ;;  %2795 = vmatprep.subr.bf16.mxu1 %v3271_v18  ;;  %v1527_v14 = vrot.slane %v1522_v13, %v295_v24  ;;  %v1531_v15 = vrot.slane %v1522_v13, %v299_v26  ;;  %v1535_v26 = vrot.slane %v1522_v13, %v303_v9 }
 0x19f   :  { %v2708_v19 = vpop.f32.mrf.mxu0 }
 0x1a0   :  { %v2709_v22 = vadd.f32 %v2708_v19, %v2707_v17  ;;  %2796 = vmatpush3.bf16.msra.mxu1 %v3106_v16 }
 0x1a1   :  { %v2710_v27 = vpop.f32.mrf.mxu0  ;;  %2797 = vmatprep.subr.bf16.mxu1 %v3271_v18 }
 0x1a2   :  { %v1375_v25 = vadd.f32 %v2709_v22, %v1335_v20 }
 0x1a3   :  { %v2711_v28 = vpop.f32.mrf.mxu0 }
 0x1a4   :  { %v1415_v29 = vadd.f32 %v1414_v59, %v1375_v25  ;;  %2798 = vmatpush3.bf16.msra.mxu1 %v3110_v10  ;;  %v3138_v59 = vld [vmem:[#allocation8 + $0x10] sm:$0xff]  }
 0x1a5   :  { %2803 = vmatprep.subr.bf16.mxu1 %v3271_v18 }
 0x1a6   :  { %v1422_v30 = vmax.f32 %v1415_v29, 0.0 }
 0x1a8   :  { %v1425_v32 = vpack.c.bf16 %v1422_v30, %v1422_v30 }
 0x1aa   :  { %1997 = vmatmul.mubr.bf16.vlgmr.msra.gmra.mxu0 %v1425_v32  ;;  %2800 = vmatmul.mubr.bf16.vlgmr.msra.gmra.mxu1 %v1425_v32 }
 0x1ab   :  { %2716 = vmatpush3.bf16.msra.mxu0 %v3112_v31  ;;  %2037 = vmatprep.mubr.bf16.mxu0 %v1424_v2  ;;  %v3146_v2 = vld [vmem:[#allocation8 + $0xa0] sm:$0xff]  }
 0x1ac   :  { %2717 = vmatprep.subr.bf16.mxu0 %v3113_v33  ;;  %2819 = vmatprep.mubr.msk.bf16.mxu1 %vm3273_vm0, %v3271_v18 }
 0x1ad   :  { %2804 = vmatpush3.bf16.msra.mxu1 %v3143_v63 }
 0x1ae   :  { %2805 = vmatprep.subr.bf16.mxu1 %v3271_v18 }
 0x1af   :  { %2718 = vmatpush3.bf16.msra.mxu0 %v3114_v34 }
 0x1b0   :  { %2719 = vmatprep.subr.bf16.mxu0 %v3115_v35 }
 0x1b1   :  { %2806 = vmatpush3.bf16.msra.mxu1 %v3144_v0 }
 0x1b2   :  { %2807 = vmatprep.subr.bf16.mxu1 %v3271_v18 }
 0x1b3   :  { %2720 = vmatpush3.bf16.msra.mxu0 %v3116_v36 }
 0x1b4   :  { %2721 = vmatprep.subr.bf16.mxu0 %v3117_v37 }
 0x1b5   :  { %2808 = vmatpush3.bf16.msra.mxu1 %v3145_v1 }
 0x1b6   :  { %2809 = vmatprep.subr.bf16.mxu1 %v3271_v18 }
 0x1b7   :  { %2722 = vmatpush3.bf16.msra.mxu0 %v3118_v38 }
 0x1b8   :  { %2723 = vmatprep.subr.bf16.mxu0 %v3119_v39 }
 0x1b9   :  { %2810 = vmatpush3.bf16.msra.mxu1 %v3146_v2 }
 0x1ba   :  { %2811 = vmatprep.subr.bf16.mxu1 %v3271_v18 }
 0x1bb   :  { %2724 = vmatpush3.bf16.msra.mxu0 %v3120_v40 }
 0x1bc   :  { %2725 = vmatprep.subr.bf16.mxu0 %v3121_v41 }
 0x1bd   :  { %2812 = vmatpush3.bf16.msra.mxu1 %v3147_v3 }
 0x1be   :  { %2813 = vmatprep.subr.bf16.mxu1 %v3271_v18 }
 0x1bf   :  { %2726 = vmatpush3.bf16.msra.mxu0 %v3122_v42 }
 0x1c0   :  { %2727 = vmatprep.subr.bf16.mxu0 %v3123_v43 }
 0x1c3   :  { %2728 = vmatpush3.bf16.msra.mxu0 %v3124_v44 }
 0x1c4   :  { %2729 = vmatprep.subr.bf16.mxu0 %v3125_v45 }
 0x1c7   :  { %2730 = vmatpush3.bf16.msra.mxu0 %v3126_v46 }
 0x1c8   :  { %2746 = vmatprep.subr.bf16.mxu0 %v3127_v47 }
 0x1ca   :  { %2038 = vmatmul.mubr.bf16.vlgmr.msra.gmra.mxu0 %v3365_v4  ;;  %v3148_v4 = vld [vmem:[#allocation8 + $0x90] sm:$0xff]  }
 0x1cb   :  { %2747 = vmatpush3.bf16.msra.mxu0 %v3128_v48  ;;  %2814 = vmatpush3.bf16.msra.mxu1 %v3148_v4  ;;  %v2622_v48 = vld [vmem:[%s3413_s6] ss:$0 sm:$0xff]  ;;  %s3274_s6 = smov [#allocation10]  }
 0x1cc   :  { %2748 = vmatprep.subr.bf16.mxu0 %v3129_v49  ;;  %2815 = vmatprep.subr.bf16.mxu1 %v3271_v18  ;;  %s2390_s25 = sshll.u32 %s3274_s6, 4  ;;  %s2391_s25 = int_to_ptr.vmem [resolvable:$true] %s2390_s25 }
 0x1cd   :  { %s3235_s26 = scalar_lea.vmem %s2391_s25, 128  ;;  %p3240_p7 = scmp.lt.s32.totalorder %s2391_s25, %s2391_s25 }
 0x1ce   :  { %p3236_p6 = scmp.ne.s32.totalorder %s2391_s25, %s3235_s26  ;;  %p3241_p8 = scmp.lt.s32.totalorder %s3235_s26, %s3235_s26 }
 0x1cf   :  { %2749 = vmatpush3.bf16.msra.mxu0 %v3130_v50  ;;  %2816 = vmatpush3.bf16.msra.mxu1 %v3149_v5 }
 0x1d0   :  { %2750 = vmatprep.subr.bf16.mxu0 %v3131_v51  ;;  %2817 = vmatprep.subr.bf16.mxu1 %v3271_v18  ;;  %p3242_p9 = por %p3241_p8, %p3240_p7 }
 0x1d2   :  { %p3243_p10 = pnand %p3242_p9, %p3236_p6 }
 0x1d3   :  { %2751 = vmatpush3.bf16.msra.mxu0 %v3132_v53  ;;  %2818 = vmatpush3.bf16.msra.mxu1 %v3150_v6 }
 0x1d4   :  { %2752 = vmatprep.subr.bf16.mxu0 %v3133_v54 }
 0x1d7   :  { %2753 = vmatpush3.bf16.msra.mxu0 %v3134_v55 }
 0x1d8   :  { %2754 = vmatprep.subr.bf16.mxu0 %v3135_v56 }
 0x1db   :  { %2755 = vmatpush3.bf16.msra.mxu0 %v3136_v57 }
 0x1dc   :  { %2756 = vmatprep.subr.bf16.mxu0 %v3137_v58 }
 0x1df   :  { %2757 = vmatpush3.bf16.msra.mxu0 %v3138_v59 }
 0x1e0   :  { %2758 = vmatprep.subr.bf16.mxu0 %v3139_v60 }
 0x1e3   :  { %2759 = vmatpush3.bf16.msra.mxu0 %v3140_v52 }
 0x1e4   :  { %2760 = vmatprep.subr.bf16.mxu0 %v3141_v61 }
 0x1e7   :  { %2761 = vmatpush3.bf16.msra.mxu0 %v3142_v62 }
 0x247   :  { %v1957_v7 = vpop.f32.mrf.mxu1 }
 0x248   :  { %v1958_v16 = vadd.f32 %v1957_v7, %v1527_v14 }
 0x249   :  { %v1959_v8 = vpop.f32.mrf.mxu1 }
 0x24a   :  { %v1960_v18 = vadd.f32 %v1959_v8, %v1531_v15 }
 0x24b   :  { %v1961_v11 = vpop.f32.mrf.mxu1 }
 0x24d   :  { %v1962_v12 = vpop.f32.mrf.mxu1 }
 0x26a   :  { %v1998_v17 = vpop.f32.mrf.mxu0  ;;  %v2079_v19 = vpop.f32.mrf.mxu1 }
 0x26b   :  { %v1999_v20 = vadd.f32 %v1998_v17, %v1958_v16 }
 0x26c   :  { %v2000_v22 = vpop.f32.mrf.mxu0  ;;  %v2801_v10 = vpop.f32.mrf.mxu1 }
 0x26d   :  { %v2001_v27 = vadd.f32 %v2000_v22, %v1960_v18  ;;  %v2085_v25 = vmax.f32 %v1999_v20, 0.0 }
 0x26e   :  { %v2002_v28 = vpop.f32.mrf.mxu0  ;;  %v2082_v29 = vpop.f32.mrf.mxu1 }
 0x26f   :  { %v2086_v30 = vmax.f32 %v2001_v27, 0.0  ;;  %v2088_v34 = vpack.c.bf16 %v2085_v25, %v2085_v25 }
 0x270   :  { %v2003_v31 = vpop.f32.mrf.mxu0  ;;  %v2802_v32 = vpop.f32.mrf.mxu1 }
 0x271   :  { %v2089_v33 = vpack.c.bf16 %v2086_v30, %v2086_v30 }
 0x273   :  { %2322 = vmatprep.mubr.bf16.mxu0 %v2089_v33 }
 0x274   :  { %2323 = vmatmul.mubr.bf16.vlgmr.msra.gmra.mxu0 %v2088_v34 }
 0x28a   :  { %v2731_v24 = vpop.f32.mrf.mxu0 }
 0x28c   :  { %v2732_v35 = vpop.f32.mrf.mxu0 }
 0x28d   :  { %v2733_v36 = vadd.f32 %v2732_v35, %v2731_v24 }
 0x28e   :  { %v2734_v37 = vpop.f32.mrf.mxu0 }
 0x28f   :  { %v2040_v38 = vadd.f32 %v2733_v36, %v1535_v26 }
 0x290   :  { %v2735_v39 = vpop.f32.mrf.mxu0 }
 0x291   :  { %v2080_v40 = vadd.f32 %v2079_v19, %v2040_v38 }
 0x293   :  { %v2087_v41 = vmax.f32 %v2080_v40, 0.0 }
 0x295   :  { %v2090_v42 = vpack.c.bf16 %v2087_v41, %v2087_v41 }
 0x297   :  { %2820 = vmatmul.mubr.bf16.vlgmr.msra.gmra.mxu1 %v2090_v42 }
 0x334   :  { %v2762_v43 = vpop.f32.mrf.mxu0 }
 0x336   :  { %v2763_v44 = vpop.f32.mrf.mxu0 }
 0x337   :  { %v2764_v47 = vadd.f32 %v2763_v44, %v2762_v43 }
 0x338   :  { %v2765_v45 = vpop.f32.mrf.mxu0 }
 0x339   :  { %v2325_v9 = vadd.f32 %v2764_v47, %v2622_v48 }
 0x33a   :  { %v2766_v46 = vpop.f32.mrf.mxu0 }
 0x357   :  { %v2364_v49 = vpop.f32.mrf.mxu1 }
 0x358   :  { %v2365_v50 = vadd.f32 %v2364_v49, %v2325_v9 }
 0x359   :  { %v2821_v51 = vpop.f32.mrf.mxu1 }
 0x35a   :  { %v2373_v53 = vsel %vm2372_vm2, %v2365_v50, -1e+30 }
 0x35b   :  { %v2367_v54 = vpop.f32.mrf.mxu1  ;;  %2374 = vmax.xlane.f32.xlu0 %v2373_v53 }
 0x35d   :  { %v2822_v55 = vpop.f32.mrf.mxu1 }
 0x3e4   :  { %v2375_v56 = vpop.xlane.xlu0 %2374 }
 0x3e5   :  { %v2376_v57 = vsub.f32 %v2373_v53, %v2375_v56 }
 0x3e7   :  { %v2377_v58 = vmul.f32 1.442695, %v2376_v57 }
 0x3e9   :  { %3151 = vpow2.f32 %v2377_v58 }
 0x3f6   :  { %v3152_v59 = vpop.eup %3151 }
 0x3f7   :  { %2379 = vadd.xlane.f32.xlu0 %v3152_v59 }
 0x480   :  { %v2380_v60 = vpop.xlane.xlu0 %2379 }
 0x481   :  { %3153 = vrcp.f32 %v2380_v60 }
 0x48e   :  { %v3154_v21 = vpop.eup %3153 }
 0x48f   :  { %v2382_v52 = vmul.f32 %v3154_v21, %v3152_v59 }
 0x491   :  { %2383 = vst [vmem:[#allocation10] sm:$0xff] %v2382_v52 }
 0x492   :  { %3246 = shalt.err (!%p3243_p10)
}
 0x493   :  { %2393 = dma.vmem_to_hbm [thread:$0]  %s2391_s25, 128, %s3414_s7, [#allocation4]  }
 0x494   :  { %3261 = dma.done.wait [#allocation4], 128  }
 0x495   :  { %3262 = vsyncadd [#allocation4], 4294967168 }
 0x496   :  { %2397 = vsyncpa [#allocation3], 1 }
 0x497   :  { %2398 = vsyncpa [#allocation6], 1 }
 0x498   :  { %2399 = vsyncpa [#allocation9], 1 }
 0x499   :  { %2400 = vsyncpa [#allocation4], 1 }

</bundles_post_ra>
